<compile_context>
chip_gen: v7x
topology: tpu7x:2x2x1
jax: 0.10.0
libtpu: 0.0.40
codegen_flags: <defaults>
</compile_context>

<pallas_src>
import functools

import jax
import jax.numpy as jnp
from jax import lax
from jax.experimental import pallas as pl
from jax.experimental.pallas import tpu as pltpu

_LN_EPS = 1e-5                       # PyTorch nn.LayerNorm default eps
_VMEM_BUDGET = 48 * 1024 * 1024      # conservative vs. v7x's 64 MiB physical VMEM


def _round_up(a, b):
    return ((a + b - 1) // b) * b


def prenorm_ffn_kernel(x_ref, g_ref, bta_ref, w1_ref, b1_ref, w2_ref, b2_ref,
                       o_ref, *, exact_gelu=True):
    # x_ref: (TM, D) tile of rows (bf16 or f32). All other operands are resident.
    x = x_ref[...].astype(jnp.float32)
    d = x.shape[-1]

    # LayerNorm with fused statistics: sum and sum-of-squares in one pass so both
    # XLU reductions issue back-to-back ahead of the first matmul.
    inv_d = 1.0 / d
    s1 = jnp.sum(x, axis=-1, keepdims=True)
    s2 = jnp.sum(x * x, axis=-1, keepdims=True)
    mean = s1 * inv_d
    var = jnp.maximum(s2 * inv_d - mean * mean, 0.0)
    xn = (x - mean) * lax.rsqrt(var + _LN_EPS)
    xn = xn * g_ref[...].astype(jnp.float32) + bta_ref[...].astype(jnp.float32)

    # FeedForward: Linear -> GELU -> Linear. bf16 MXU operands, f32 accumulation.
    h = jnp.dot(xn.astype(w1_ref.dtype), w1_ref[...],
                preferred_element_type=jnp.float32)
    h = h + b1_ref[...].astype(jnp.float32)
    # Exact erf GELU = PyTorch nn.GELU default (erf maps onto the EUP, ~free).
    h = jax.nn.gelu(h, approximate=not exact_gelu)
    y = jnp.dot(h.astype(w2_ref.dtype), w2_ref[...],
                preferred_element_type=jnp.float32)
    y = y + b2_ref[...].astype(jnp.float32)
    o_ref[...] = y.astype(o_ref.dtype)


def _pick_tile_m(m, requested, align):
    """Row-tile: packing-aligned, <= padded row count, >=2 grid steps when possible."""
    m_pad = _round_up(m, align)
    tm = min(_round_up(requested, align), m_pad)
    if tm >= m_pad and m_pad > align:
        # Split rows into at least two grid steps so the "parallel" axis can be
        # sharded across v7x's two TensorCores (harmless on v5e/v6e).
        tm = _round_up(pl.cdiv(m, 2), align)
    return max(tm, align)


def _vmem_estimate(tile_m, d, h, act_bytes, weight_bufs):
    io_tiles = 2 * (2 * tile_m * d * act_bytes)          # double-buffered x + out tiles
    weights = weight_bufs * 2 * (d * h + h * d)          # bf16 W1 + W2
    params = weight_bufs * 4 * (3 * d + h)               # f32 gamma, beta, b1, b2
    live = tile_m * h * 4 + 2 * tile_m * d * 4           # h intermediate + f32 x/xn temps
    return io_tiles + weights + params + live


@functools.partial(jax.jit,
                   static_argnames=("tile_m", "single_buffer_weights", "exact_gelu"))
def _prenorm_feedforward(x, gamma, beta, w1, b1, w2, b2, *,
                         tile_m, single_buffer_weights, exact_gelu):
    B, S, D = x.shape
    H = w1.shape[1]
    M = B * S

    # No host-side padding: the grid over-covers M; Pallas clips the ragged last
    # block (garbage rows stay in-tile and their writes are dropped).
    x2 = x.reshape(M, D)
    act_bytes = x2.dtype.itemsize
    align = 8 if act_bytes >= 4 else (16 if act_bytes == 2 else 32)
    wbufs = 1 if single_buffer_weights else 2

    tm = _pick_tile_m(M, tile_m, align)
    while tm > align and _vmem_estimate(tm, D, H, act_bytes, wbufs) > _VMEM_BUDGET:
        tm = max(align, _round_up(tm // 2, align))
    grid_m = pl.cdiv(M, tm)

    # Weights in bf16 (native MXU datapath, half the resident VMEM / DMA traffic);
    # LayerNorm params and biases stay f32.
    w1b = w1.astype(jnp.bfloat16)
    w2b = w2.astype(jnp.bfloat16)
    g2 = gamma.reshape(1, D).astype(jnp.float32)
    bt2 = beta.reshape(1, D).astype(jnp.float32)
    b1_2 = b1.reshape(1, H).astype(jnp.float32)
    b2_2 = b2.reshape(1, D).astype(jnp.float32)

    def resident(shape):
        # Grid-invariant operands: fetched once; single-buffered when supported.
        if single_buffer_weights:
            return pl.BlockSpec(shape, lambda i: (0, 0),
                                pipeline_mode=pl.Buffered(1))
        return pl.BlockSpec(shape, lambda i: (0, 0))

    est = _vmem_estimate(tm, D, H, act_bytes, wbufs)
    vmem_limit = int(min(max(est * 5 // 4 + (4 << 20), 32 << 20), 96 << 20))

    cost = pl.CostEstimate(
        flops=4 * M * D * H + 8 * M * D,
        transcendentals=M * H + M,
        bytes_accessed=2 * M * D * act_bytes + 2 * (D * H + H * D) + 4 * (3 * D + H),
    )

    out = pl.pallas_call(
        functools.partial(prenorm_ffn_kernel, exact_gelu=exact_gelu),
        out_shape=jax.ShapeDtypeStruct((M, D), x.dtype),
        grid=(grid_m,),
        in_specs=[
            pl.BlockSpec((tm, D), lambda i: (i, 0)),   # x rows (pipelined, streamed)
            resident((1, D)),                          # LN gamma
            resident((1, D)),                          # LN beta
            resident((D, H)),                          # W1
            resident((1, H)),                          # b1
            resident((H, D)),                          # W2
            resident((1, D)),                          # b2
        ],
        out_specs=pl.BlockSpec((tm, D), lambda i: (i, 0)),
        compiler_params=pltpu.CompilerParams(
            dimension_semantics=("parallel",),          # megacore-shard the row axis
            vmem_limit_bytes=vmem_limit,
        ),
        cost_estimate=cost,
    )(x2, g2, bt2, w1b, b1_2, w2b, b2_2)

    return out.reshape(B, S, D)


def prenorm_feedforward(x, gamma, beta, w1, b1, w2, b2, *, tile_m=512):
    """PreNorm(dim, FeedForward)(x): Linear(GELU(Linear(LayerNorm(x))))."""
    # Graceful degradation for JAX builds that reject pipeline_mode=pl.Buffered(1)
    # or the exact-erf GELU lowering. The first (fully optimized) config is the
    # intended one and is used whenever it compiles.
    configs = (
        dict(single_buffer_weights=True, exact_gelu=True),
        dict(single_buffer_weights=False, exact_gelu=True),
        dict(single_buffer_weights=False, exact_gelu=False),  # tanh-GELU fallback
    )
    last_err = None
    for cfg in configs:
        try:
            return _prenorm_feedforward(x, gamma, beta, w1, b1, w2, b2,
                                        tile_m=tile_m, **cfg)
        except Exception as err:  # noqa: BLE001 - compile-time feature probing
            last_err = err
    raise last_err


if __name__ == "__main__":
    # Small but lane-dense demo shapes: D is a multiple of 256 (fills the v6e/v7x
    # MXU contraction), H a multiple of 128; M = 32 rows -> two grid steps.
    B, S, D, H = 2, 16, 256, 512
    key = jax.random.PRNGKey(0)
    kx, kg, kb, k1, k2, k3, k4 = jax.random.split(key, 7)

    # bf16 activations (halves x/out DMA); parameters stay f32 like PyTorch.
    x = jax.random.normal(kx, (B, S, D), dtype=jnp.float32).astype(jnp.bfloat16)
    gamma = 1.0 + 0.1 * jax.random.normal(kg, (D,), dtype=jnp.float32)
    beta = 0.1 * jax.random.normal(kb, (D,), dtype=jnp.float32)
    w1 = jax.random.normal(k1, (D, H), dtype=jnp.float32) * (1.0 / jnp.sqrt(D))
    b1 = jax.random.normal(k2, (H,), dtype=jnp.float32) * 0.01
    w2 = jax.random.normal(k3, (H, D), dtype=jnp.float32) * (1.0 / jnp.sqrt(H))
    b2 = jax.random.normal(k4, (D,), dtype=jnp.float32) * 0.01

    out = prenorm_feedforward(x, gamma, beta, w1, b1, w2, b2)
    jax.block_until_ready(out)

    # Pure-JAX reference of fn(norm(x)) with matching bf16 matmul casts.
    xf = x.reshape(-1, D).astype(jnp.float32)
    mean = xf.mean(-1, keepdims=True)
    var = ((xf - mean) ** 2).mean(-1, keepdims=True)
    xn = (xf - mean) / jnp.sqrt(var + _LN_EPS) * gamma + beta
    h = jnp.dot(xn.astype(jnp.bfloat16), w1.astype(jnp.bfloat16),
                preferred_element_type=jnp.float32) + b1
    h = jax.nn.gelu(h, approximate=False)
    ref = (jnp.dot(h.astype(jnp.bfloat16), w2.astype(jnp.bfloat16),
                   preferred_element_type=jnp.float32) + b2).reshape(B, S, D)

    err = float(jnp.max(jnp.abs(out.astype(jnp.float32) - ref)))
    assert err < 5e-2, f"max abs err = {err}"
    print("KERNEL_OK")
</pallas_src>

<mosaic_0001>
module attributes {stable_mosaic.version = 11 : i64} {
  func.func @prenorm_ffn_kernel(%arg0: i32, %arg1: memref<16x256xbf16, #tpu.memory_space<vmem>>, %arg2: memref<1x256xf32, #tpu.memory_space<vmem>>, %arg3: memref<1x256xf32, #tpu.memory_space<vmem>>, %arg4: memref<256x512xbf16, #tpu.memory_space<vmem>>, %arg5: memref<1x512xf32, #tpu.memory_space<vmem>>, %arg6: memref<512x256xbf16, #tpu.memory_space<vmem>>, %arg7: memref<1x256xf32, #tpu.memory_space<vmem>>, %arg8: memref<16x256xbf16, #tpu.memory_space<vmem>>) attributes {dimension_semantics = [#tpu.dimension_semantics<parallel>], iteration_bounds = array<i64: 2>, scalar_prefetch = 0 : i64, scratch_operands = 0 : i64, tpu.core_type = #tpu.core_type<tc>, window_params = [{transform_indices = @transform_0, window_bounds = array<i64: 16, 256>}, {pipeline_mode = #tpu.pipeline_mode<synchronous>, transform_indices = @transform_1, window_bounds = array<i64: 1, 256>}, {pipeline_mode = #tpu.pipeline_mode<synchronous>, transform_indices = @transform_2, window_bounds = array<i64: 1, 256>}, {pipeline_mode = #tpu.pipeline_mode<synchronous>, transform_indices = @transform_3, window_bounds = array<i64: 256, 512>}, {pipeline_mode = #tpu.pipeline_mode<synchronous>, transform_indices = @transform_4, window_bounds = array<i64: 1, 512>}, {pipeline_mode = #tpu.pipeline_mode<synchronous>, transform_indices = @transform_5, window_bounds = array<i64: 512, 256>}, {pipeline_mode = #tpu.pipeline_mode<synchronous>, transform_indices = @transform_6, window_bounds = array<i64: 1, 256>}, {transform_indices = @transform_7, window_bounds = array<i64: 16, 256>}]} {
    %c0 = arith.constant 0 : index
    %c0_0 = arith.constant 0 : index
    %0 = vector.load %arg1[%c0, %c0_0] : memref<16x256xbf16, #tpu.memory_space<vmem>>, vector<16x256xbf16>
    %1 = arith.extf %0 : vector<16x256xbf16> to vector<16x256xf32>
    %cst = arith.constant dense<0.000000e+00> : vector<16xf32>
    %2 = vector.multi_reduction <add>, %1, %cst [1] : vector<16x256xf32> to vector<16xf32>
    %3 = vector.shape_cast %2 : vector<16xf32> to vector<16x1xf32>
    %4 = arith.mulf %1, %1 : vector<16x256xf32>
    %cst_1 = arith.constant dense<0.000000e+00> : vector<16xf32>
    %5 = vector.multi_reduction <add>, %4, %cst_1 [1] : vector<16x256xf32> to vector<16xf32>
    %6 = vector.shape_cast %5 : vector<16xf32> to vector<16x1xf32>
    %cst_2 = arith.constant 3.906250e-03 : f32
    %7 = vector.broadcast %cst_2 : f32 to vector<16x1xf32>
    %8 = arith.mulf %3, %7 : vector<16x1xf32>
    %cst_3 = arith.constant 3.906250e-03 : f32
    %9 = vector.broadcast %cst_3 : f32 to vector<16x1xf32>
    %10 = arith.mulf %6, %9 : vector<16x1xf32>
    %11 = arith.mulf %8, %8 : vector<16x1xf32>
    %12 = arith.subf %10, %11 : vector<16x1xf32>
    %cst_4 = arith.constant 0.000000e+00 : f32
    %13 = vector.broadcast %cst_4 : f32 to vector<16x1xf32>
    %14 = arith.maximumf %12, %13 : vector<16x1xf32>
    %15 = vector.broadcast %8 : vector<16x1xf32> to vector<16x256xf32>
    %16 = arith.subf %1, %15 : vector<16x256xf32>
    %cst_5 = arith.constant 9.99999974E-6 : f32
    %17 = vector.broadcast %cst_5 : f32 to vector<16x1xf32>
    %18 = arith.addf %14, %17 : vector<16x1xf32>
    %19 = math.rsqrt %18 : vector<16x1xf32>
    %20 = vector.broadcast %19 : vector<16x1xf32> to vector<16x256xf32>
    %21 = arith.mulf %16, %20 : vector<16x256xf32>
    %c0_6 = arith.constant 0 : index
    %c0_7 = arith.constant 0 : index
    %22 = vector.load %arg2[%c0_6, %c0_7] : memref<1x256xf32, #tpu.memory_space<vmem>>, vector<1x256xf32>
    %23 = vector.broadcast %22 : vector<1x256xf32> to vector<16x256xf32>
    %24 = arith.mulf %21, %23 : vector<16x256xf32>
    %c0_8 = arith.constant 0 : index
    %c0_9 = arith.constant 0 : index
    %25 = vector.load %arg3[%c0_8, %c0_9] : memref<1x256xf32, #tpu.memory_space<vmem>>, vector<1x256xf32>
    %26 = vector.broadcast %25 : vector<1x256xf32> to vector<16x256xf32>
    %27 = arith.addf %24, %26 : vector<16x256xf32>
    %28 = arith.truncf %27 : vector<16x256xf32> to vector<16x256xbf16>
    %c0_10 = arith.constant 0 : index
    %c0_11 = arith.constant 0 : index
    %29 = vector.load %arg4[%c0_10, %c0_11] : memref<256x512xbf16, #tpu.memory_space<vmem>>, vector<256x512xbf16>
    %cst_12 = arith.constant dense<0.000000e+00> : vector<16x512xf32>
    %30 = tpu.matmul %28, %29, %cst_12 {dimension_numbers = #tpu.dot_dimension_numbers<[1], [0], [0], [1], [0, 0, 1, 1], [], []>} : vector<16x256xbf16>, vector<256x512xbf16>, vector<16x512xf32> -> vector<16x512xf32>
    %c0_13 = arith.constant 0 : index
    %c0_14 = arith.constant 0 : index
    %31 = vector.load %arg5[%c0_13, %c0_14] : memref<1x512xf32, #tpu.memory_space<vmem>>, vector<1x512xf32>
    %32 = vector.broadcast %31 : vector<1x512xf32> to vector<16x512xf32>
    %33 = arith.addf %30, %32 : vector<16x512xf32>
    %34 = arith.mulf %33, %33 : vector<16x512xf32>
    %35 = arith.mulf %33, %34 : vector<16x512xf32>
    %cst_15 = arith.constant 4.471500e-02 : f32
    %36 = vector.broadcast %cst_15 : f32 to vector<16x512xf32>
    %37 = arith.mulf %36, %35 : vector<16x512xf32>
    %38 = arith.addf %33, %37 : vector<16x512xf32>
    %cst_16 = arith.constant 0.797884583 : f32
    %39 = vector.broadcast %cst_16 : f32 to vector<16x512xf32>
    %40 = arith.mulf %39, %38 : vector<16x512xf32>
    %41 = math.tanh %40 : vector<16x512xf32>
    %cst_17 = arith.constant 1.000000e+00 : f32
    %42 = vector.broadcast %cst_17 : f32 to vector<16x512xf32>
    %43 = arith.addf %42, %41 : vector<16x512xf32>
    %cst_18 = arith.constant 5.000000e-01 : f32
    %44 = vector.broadcast %cst_18 : f32 to vector<16x512xf32>
    %45 = arith.mulf %44, %43 : vector<16x512xf32>
    %46 = arith.mulf %33, %45 : vector<16x512xf32>
    %47 = arith.truncf %46 : vector<16x512xf32> to vector<16x512xbf16>
    %c0_19 = arith.constant 0 : index
    %c0_20 = arith.constant 0 : index
    %48 = vector.load %arg6[%c0_19, %c0_20] : memref<512x256xbf16, #tpu.memory_space<vmem>>, vector<512x256xbf16>
    %cst_21 = arith.constant dense<0.000000e+00> : vector<16x256xf32>
    %49 = tpu.matmul %47, %48, %cst_21 {dimension_numbers = #tpu.dot_dimension_numbers<[1], [0], [0], [1], [0, 0, 1, 1], [], []>} : vector<16x512xbf16>, vector<512x256xbf16>, vector<16x256xf32> -> vector<16x256xf32>
    %c0_22 = arith.constant 0 : index
    %c0_23 = arith.constant 0 : index
    %50 = vector.load %arg7[%c0_22, %c0_23] : memref<1x256xf32, #tpu.memory_space<vmem>>, vector<1x256xf32>
    %51 = vector.broadcast %50 : vector<1x256xf32> to vector<16x256xf32>
    %52 = arith.addf %49, %51 : vector<16x256xf32>
    %53 = arith.truncf %52 : vector<16x256xf32> to vector<16x256xbf16>
    %c0_24 = arith.constant 0 : index
    %c0_25 = arith.constant 0 : index
    %54 = vector.load %arg8[%c0_24, %c0_25] : memref<16x256xbf16, #tpu.memory_space<vmem>>, vector<16x256xbf16>
    tpu.vector_store %arg8[%c0_24, %c0_25], %53 {strides = array<i32>} : memref<16x256xbf16, #tpu.memory_space<vmem>>, vector<16x256xbf16>,
    return
  }
  func.func @transform_0(%arg0: i32) -> (i32, i32) {
    %c0_i32 = arith.constant 0 : i32
    %c0_i32_0 = arith.constant 0 : i32
    return %arg0, %c0_i32 : i32, i32
  }
  func.func @transform_1(%arg0: i32) -> (i32, i32) {
    %c0_i32 = arith.constant 0 : i32
    %c0_i32_0 = arith.constant 0 : i32
    %c0_i32_1 = arith.constant 0 : i32
    return %c0_i32, %c0_i32_0 : i32, i32
  }
  func.func @transform_2(%arg0: i32) -> (i32, i32) {
    %c0_i32 = arith.constant 0 : i32
    %c0_i32_0 = arith.constant 0 : i32
    %c0_i32_1 = arith.constant 0 : i32
    return %c0_i32, %c0_i32_0 : i32, i32
  }
  func.func @transform_3(%arg0: i32) -> (i32, i32) {
    %c0_i32 = arith.constant 0 : i32
    %c0_i32_0 = arith.constant 0 : i32
    %c0_i32_1 = arith.constant 0 : i32
    return %c0_i32, %c0_i32_0 : i32, i32
  }
  func.func @transform_4(%arg0: i32) -> (i32, i32) {
    %c0_i32 = arith.constant 0 : i32
    %c0_i32_0 = arith.constant 0 : i32
    %c0_i32_1 = arith.constant 0 : i32
    return %c0_i32, %c0_i32_0 : i32, i32
  }
  func.func @transform_5(%arg0: i32) -> (i32, i32) {
    %c0_i32 = arith.constant 0 : i32
    %c0_i32_0 = arith.constant 0 : i32
    %c0_i32_1 = arith.constant 0 : i32
    return %c0_i32, %c0_i32_0 : i32, i32
  }
  func.func @transform_6(%arg0: i32) -> (i32, i32) {
    %c0_i32 = arith.constant 0 : i32
    %c0_i32_0 = arith.constant 0 : i32
    %c0_i32_1 = arith.constant 0 : i32
    return %c0_i32, %c0_i32_0 : i32, i32
  }
  func.func @transform_7(%arg0: i32) -> (i32, i32) {
    %c0_i32 = arith.constant 0 : i32
    %c0_i32_0 = arith.constant 0 : i32
    return %arg0, %c0_i32 : i32, i32
  }
}

</mosaic_0001>

<bundles_post_ra>
// kernel: _prenorm_feedforward.1
= control target key start
LH: loop header
LB: loop body
LE: loop exit
PB: predicated region body
PF: predicated region fallthrough
CT: control target
= control target key end

     0   :  { %12 = vsyncpa [#allocation3], 0  ;;  %s2597_s0 = inlined_call_operand.vmem [shape: bf16[32,256], index: 0, kind: input, shape index: {}]   ;;  %s2598_s1 = inlined_call_operand.vmem [shape: f32[1,256], index: 1, kind: input, shape index: {}]   ;;  %s2599_s2 = inlined_call_operand.vmem [shape: f32[1,256], index: 2, kind: input, shape index: {}]   ;;  %s2600_s3 = inlined_call_operand.vmem [shape: bf16[256,512], index: 3, kind: input, shape index: {}]   ;;  %s2601_s4 = inlined_call_operand.vmem [shape: f32[1,512], index: 4, kind: input, shape index: {}]   ;;  %s2602_s5 = inlined_call_operand.vmem [shape: bf16[512,256], index: 5, kind: input, shape index: {}]   ;;  %s2603_s6 = inlined_call_operand.vmem [shape: f32[1,256], index: 6, kind: input, shape index: {}]   ;;  %s2604_s7 = inlined_call_operand.hbm [shape: bf16[32,256], index: 7, kind: output, shape index: {}]  }
   0x1   :  { %14 = vsyncpa [#allocation3 + $0x1], 0  ;;  %s2019_s24 = smov 0   ;;  %s2021_s25 = smov 0  }
   0x2   :  { %s2023_s26 = smov 0   ;;  %s2025_s27 = smov 0  }
   0x3 LB: > { %s2040_s28 = sadd.s32 4294967295, %s1974_s27   ;;  %s1502_s29 = sadd.s32 4294967294, %s1974_s27   ;;  %s1974_s27 = sphi %s2025_s27, %s2610_s27   ;;  %s1970_s26 = sphi %s2023_s26, %s2609_s26   ;;  %s1966_s25 = sphi %s2021_s25, %s2608_s25   ;;  %s1962_s24 = sphi %s2019_s24, %s2607_s24  }
   0x4   : > { %s2044_s30 = sadd.s32 1, %s1974_s27   ;;  %s179_s8 = sadd.s32 1, %s1970_s26 }
   0x5   : > { %s176_s9 = ssub.s32 %s1974_s27, %s2044_s30  ;;  %p189_p0 = scmp.ne.s32.totalorder %s1970_s26, %s1966_s25 }
   0x6   : > { %p177_p1 = scmp.eq.s32.totalorder %s176_s9, 0  ;;  %p190_p2 = scmp.eq.s32.totalorder %s2040_s28, 1 }
   0x7   : > { %p195_p3 = scmp.ne.s32.totalorder %s1966_s25, %s1962_s24  ;;  %p196_p4 = scmp.eq.s32.totalorder %s1502_s29, 1 }
   0x8   : > { %s2055_s10 = scalar_select %p177_p1, %s1970_s26, %s179_s8  }
   0x9   : > { %p2057_p5 = por %p190_p2, %p189_p0  ;;  %p2061_p6 = por %p196_p4, %p195_p3 }
   0xa   : > { %p1505_p7 = scmp.ge.s32.totalorder %s1974_s27, 1  ;;  %p242_p8 = scmp.lt.s32.totalorder %s1974_s27, 3 }
   0xc   : > { %p243_p9 = pnand %p1505_p7, %p242_p8 }
   0xd   : > { %s1507_s13 = sshll.u32 (!%p243_p9), %s2040_s28, 1  ;;  %v1700_v0 = vld [vmem:[%s2600_s3 + $0x4] ss:$16 sps:$4 sm:$0xff] (!%p243_p9)   ;;  %v1702_v1 = vld [vmem:[%s2600_s3] ss:$16 sps:$4 sm:$0xff] (!%p243_p9)   ;;  %s272_s15 = sand.u32 (!%p243_p9), 1, %s1966_s25  }
   0xe   : > { %246 = sbr.rel (%p243_p9) target bundleno = 750 (0x2ee), region = 48  ;;  %p276_p10 = scmp.lt.s32.totalorder (!%p243_p9), %s1507_s13, 3  ;;  %767 = vmatprep.subr.bf16.mxu1 (!%p243_p9), %v1700_v0  ;;  %v1703_v2 = vld [vmem:[%s2600_s3 + $0x24] ss:$16 sps:$4 sm:$0xff] (!%p243_p9)   ;;  %v1705_v3 = vld [vmem:[%s2600_s3 + $0x20] ss:$16 sps:$4 sm:$0xff] (!%p243_p9)  }
   0xf   : > { %768 = vmatpush1.bf16.msra.mxu1 (!%p243_p9), %v1702_v1  ;;  %v1706_v4 = vld [vmem:[%s2600_s3 + $0x44] ss:$16 sps:$4 sm:$0xff] (!%p243_p9)   ;;  %v1708_v5 = vld [vmem:[%s2600_s3 + $0x40] ss:$16 sps:$4 sm:$0xff] (!%p243_p9)   ;;  %v1750_v46 = vld [vmem:[%s2600_s3 + $0xc] ss:$16 sps:$4 sm:$0xff] (!%p243_p9)  }
  0x10   : > { %769 = vmatprep.subr.bf16.mxu1 (!%p243_p9), %v1703_v2  ;;  %v1709_v12 = vld [vmem:[%s2600_s3 + $0x64] ss:$16 sps:$4 sm:$0xff] (!%p243_p9)   ;;  %v1711_v16 = vld [vmem:[%s2600_s3 + $0x60] ss:$16 sps:$4 sm:$0xff] (!%p243_p9)   ;;  %s1506_s17 = sshll.u32 (!%p243_p9), %s272_s15, 4  ;;  %s1650_s20 = sshll.u32 (!%p243_p9), %s2040_s28, 8 }
  0x11   : > { %v1712_v19 = vld [vmem:[%s2600_s3 + $0x84] ss:$16 sps:$4 sm:$0xff] (!%p243_p9)   ;;  %v1714_v22 = vld [vmem:[%s2600_s3 + $0x80] ss:$16 sps:$4 sm:$0xff] (!%p243_p9)   ;;  %s274_s18 = scalar_lea.vmem (!%p243_p9), [#allocation2], %s1506_s17  ;;  %s2554_s23 = scalar_lea.hbm (!%p243_p9), %s2604_s7, %s1650_s20 }
  0x12   : > { %v1715_v24 = vld [vmem:[%s2600_s3 + $0xa4] ss:$16 sps:$4 sm:$0xff] (!%p243_p9)   ;;  %v1717_v25 = vld [vmem:[%s2600_s3 + $0xa0] ss:$16 sps:$4 sm:$0xff] (!%p243_p9)   ;;  %s1440_s19 = sshll.u32 (!%p243_p9), %s274_s18, 4  ;;  %s1976_s8 = smov (!%p243_p9), [#allocation2]   ;;  %s2549_s19 = int_to_ptr.vmem [resolvable:$true] %s1440_s19 }
  0x13   : > { %770 = vmatpush1.bf16.msra.mxu1 (!%p243_p9), %v1705_v3  ;;  %v1718_v26 = vld [vmem:[%s2600_s3 + $0xc4] ss:$16 sps:$4 sm:$0xff] (!%p243_p9)   ;;  %v1720_v27 = vld [vmem:[%s2600_s3 + $0xc0] ss:$16 sps:$4 sm:$0xff] (!%p243_p9)   ;;  %s1912_s28 = scalar_lea.vmem (!%p243_p9), %s2549_s19, 256  ;;  %s1916_s9 = sshll.u32 (!%p243_p9), %s1976_s8, 4  ;;  %s1917_s9 = int_to_ptr.vmem [resolvable:$false] %s1916_s9 }
  0x14   : > { %771 = vmatprep.subr.bf16.mxu1 (!%p243_p9), %v1706_v4  ;;  %v1721_v28 = vld [vmem:[%s2600_s3 + $0xe4] ss:$16 sps:$4 sm:$0xff] (!%p243_p9)   ;;  %v1723_v29 = vld [vmem:[%s2600_s3 + $0xe0] ss:$16 sps:$4 sm:$0xff] (!%p243_p9)   ;;  %p1913_p11 = scmp.ne.s32.totalorder (!%p243_p9), %s2549_s19, %s1912_s28  ;;  %p1919_p0 = scmp.lt.s32.totalorder (!%p243_p9), %s2549_s19, %s1917_s9 }
  0x15   : > { %s2612_s13 = smov (!%p276_p10, %s1507_s13), 3  ;;  %v1724_v30 = vld [vmem:[%s2600_s3 + $0x104] ss:$16 sps:$4 sm:$0xff]   ;;  %v1726_v31 = vld [vmem:[%s2600_s3 + $0x100] ss:$16 sps:$4 sm:$0xff]  }
  0x16   : > { %s1646_s29 = sshll.u32 %s2612_s13, 3  ;;  %v1727_v32 = vld [vmem:[%s2600_s3 + $0x124] ss:$16 sps:$4 sm:$0xff]   ;;  %v1729_v33 = vld [vmem:[%s2600_s3 + $0x120] ss:$16 sps:$4 sm:$0xff]   ;;  %p1914_p12 = pnand %p1913_p11, %p2057_p5 }
  0x17   : > { %s280_s14 = scalar_lea.vmem %s2597_s0, %s1646_s29  ;;  %772 = vmatpush1.bf16.msra.mxu1 %v1708_v5  ;;  %v1730_v34 = vld [vmem:[%s2600_s3 + $0x144] ss:$16 sps:$4 sm:$0xff]   ;;  %v1732_v35 = vld [vmem:[%s2600_s3 + $0x140] ss:$16 sps:$4 sm:$0xff]   ;;  %s2556_s29 = scalar_lea.sflag [#allocation3], %s272_s15 }
  0x18   : > { %v283_v6 = vld [vmem:[%s280_s14] sm:$0xff]  ;;  %v284_v7 = vld [vmem:[%s280_s14 + $0x8] sm:$0xff]  ;;  %773 = vmatprep.subr.bf16.mxu1 %v1709_v12  ;;  %v1799_v49 = vld [vmem:[%s2602_s5 + $0x14] ss:$8 sps:$4 sm:$0xff]   ;;  %p1915_p13 = pneg %p1914_p12  ;;  %s1918_s14 = scalar_lea.vmem %s1917_s9, 512 }
  0x19   : > { %v2089_v8 = vunpack.c.l.bf16 %v283_v6  ;;  %v2091_v9 = vunpack.c.h.bf16 %v283_v6  ;;  %v2093_v10 = vunpack.c.l.bf16 %v284_v7  ;;  %v2095_v11 = vunpack.c.h.bf16 %v284_v7  ;;  %v1733_v36 = vld [vmem:[%s2600_s3 + $0x164] ss:$16 sps:$4 sm:$0xff]   ;;  %v1735_v37 = vld [vmem:[%s2600_s3 + $0x160] ss:$16 sps:$4 sm:$0xff]   ;;  %p1920_p1 = scmp.lt.s32.totalorder %s1918_s14, %s1912_s28 }
  0x1a   : > { %v1736_v38 = vld [vmem:[%s2600_s3 + $0x184] ss:$16 sps:$4 sm:$0xff]   ;;  %v1738_v39 = vld [vmem:[%s2600_s3 + $0x180] ss:$16 sps:$4 sm:$0xff]  }
  0x1b   : > { %v289_v13 = vadd.f32 %v2091_v9, %v2089_v8  ;;  %v295_v14 = vmul.f32 %v2089_v8, %v2089_v8  ;;  %v296_v15 = vmul.f32 %v2091_v9, %v2091_v9  ;;  %v297_v17 = vmul.f32 %v2093_v10, %v2093_v10  ;;  %774 = vmatpush1.bf16.msra.mxu1 %v1711_v16  ;;  %v1739_v40 = vld [vmem:[%s2600_s3 + $0x1a4] ss:$16 sps:$4 sm:$0xff]   ;;  %v1741_v41 = vld [vmem:[%s2600_s3 + $0x1a0] ss:$16 sps:$4 sm:$0xff]   ;;  %p1921_p2 = por %p1920_p1, %p1919_p0 }
  0x1c   : > { %v298_v18 = vmul.f32 %v2095_v11, %v2095_v11  ;;  %v292_v21 = vadd.f32 %v2095_v11, %v2093_v10  ;;  %775 = vmatprep.subr.bf16.mxu1 %v1712_v19  ;;  %v1742_v42 = vld [vmem:[%s2600_s3 + $0x1c4] ss:$16 sps:$4 sm:$0xff]   ;;  %v1744_v43 = vld [vmem:[%s2600_s3 + $0x1c0] ss:$16 sps:$4 sm:$0xff]   ;;  %v329_v16 = vlaneseq }
  0x1d   : > { %290 = vadd.xlane.f32.xlu0 %v289_v13  ;;  %v299_v20 = vadd.f32 %v296_v15, %v295_v14  ;;  %v1745_v44 = vld [vmem:[%s2600_s3 + $0x1e4] ss:$16 sps:$4 sm:$0xff]   ;;  %v1747_v45 = vld [vmem:[%s2600_s3 + $0x1e0] ss:$16 sps:$4 sm:$0xff]   ;;  %p1922_p3 = pnand %p1921_p2, %p1915_p13 }
  0x1e   : > { %v302_v23 = vadd.f32 %v298_v18, %v297_v17  ;;  %v1796_v47 = vld [vmem:[%s2602_s5 + $0x4] ss:$8 sps:$4 sm:$0xff]   ;;  %v1798_v48 = vld [vmem:[%s2602_s5] ss:$8 sps:$4 sm:$0xff]   ;;  %v1801_v50 = vld [vmem:[%s2602_s5 + $0x10] ss:$8 sps:$4 sm:$0xff]  }
  0x1f   : > { %300 = vadd.xlane.f32.xlu1 %v299_v20  ;;  %776 = vmatpush1.bf16.msra.mxu1 %v1714_v22  ;;  %v1802_v51 = vld [vmem:[%s2602_s5 + $0x24] ss:$8 sps:$4 sm:$0xff]   ;;  %v1804_v52 = vld [vmem:[%s2602_s5 + $0x20] ss:$8 sps:$4 sm:$0xff]   ;;  %v1805_v53 = vld [vmem:[%s2602_s5 + $0x34] ss:$8 sps:$4 sm:$0xff]  }
  0x20   : > { %777 = vmatprep.subr.bf16.mxu1 %v1715_v24  ;;  %1325 = vmatprep.subr.bf16.mxu0 %v1796_v47  ;;  %v1807_v54 = vld [vmem:[%s2602_s5 + $0x30] ss:$8 sps:$4 sm:$0xff]   ;;  %v1808_v55 = vld [vmem:[%s2602_s5 + $0x44] ss:$8 sps:$4 sm:$0xff]   ;;  %v1810_v56 = vld [vmem:[%s2602_s5 + $0x40] ss:$8 sps:$4 sm:$0xff]  }
  0x21   : > { %293 = vadd.xlane.f32.xlu0 %v292_v21  ;;  %1326 = vmatpush1.bf16.msra.mxu0 %v1798_v48  ;;  %v1811_v57 = vld [vmem:[%s2602_s5 + $0x54] ss:$8 sps:$4 sm:$0xff]   ;;  %v1813_v58 = vld [vmem:[%s2602_s5 + $0x50] ss:$8 sps:$4 sm:$0xff]   ;;  %v1814_v59 = vld [vmem:[%s2602_s5 + $0x64] ss:$8 sps:$4 sm:$0xff]  }
  0x22   : > { %1327 = vmatprep.subr.bf16.mxu0 %v1799_v49  ;;  %v1816_v60 = vld [vmem:[%s2602_s5 + $0x60] ss:$8 sps:$4 sm:$0xff]   ;;  %v1817_v61 = vld [vmem:[%s2602_s5 + $0x74] ss:$8 sps:$4 sm:$0xff]   ;;  %v2235_v19 = vshrl.u32 %v329_v16, 7 }
  0x23   : > { %303 = vadd.xlane.f32.xlu1 %v302_v23  ;;  %778 = vmatpush1.bf16.msra.mxu1 %v1717_v25  ;;  %v327_v22 = vld [vmem:[%s2598_s1] sm:$0x3]  ;;  %v1756_v47 = vld [vmem:[%s2600_s3 + $0x4c] ss:$16 sps:$4 sm:$0xff]   ;;  %v1754_v48 = vld [vmem:[%s2600_s3 + $0x48] ss:$16 sps:$4 sm:$0xff]  }
  0x24   : > { %779 = vmatprep.subr.bf16.mxu1 %v1718_v26  ;;  %v2238_v20 = vsub.s32 0, %v2235_v19  ;;  %v2241_v21 = vsub.s32 1, %v2235_v19  ;;  %v1759_v49 = vld [vmem:[%s2600_s3 + $0x6c] ss:$16 sps:$4 sm:$0xff]  }
  0x25   : > { %1328 = vmatpush1.bf16.msra.mxu0 %v1801_v50  ;;  %v1757_v50 = vld [vmem:[%s2600_s3 + $0x68] ss:$16 sps:$4 sm:$0xff]   ;;  %v1820_v16 = vld [vmem:[%s2602_s5 + $0x84] ss:$8 sps:$4 sm:$0xff]  }
  0x26   : > { %1329 = vmatprep.subr.bf16.mxu0 %v1802_v51  ;;  %v1762_v51 = vld [vmem:[%s2600_s3 + $0x8c] ss:$16 sps:$4 sm:$0xff]  }
  0x27   : > { %780 = vmatpush1.bf16.msra.mxu1 %v1720_v27  ;;  %v332_v27 = vrot.slane %v327_v22, %v2238_v20 }
  0x28   : > { %781 = vmatprep.subr.bf16.mxu1 %v1721_v28  ;;  %v336_v28 = vrot.slane %v327_v22, %v2241_v21  ;;  %v1825_v22 = vld [vmem:[%s2602_s5 + $0x90] ss:$8 sps:$4 sm:$0xff]  }
  0x29   : > { %1330 = vmatpush1.bf16.msra.mxu0 %v1804_v52  ;;  %v1760_v52 = vld [vmem:[%s2600_s3 + $0x88] ss:$16 sps:$4 sm:$0xff]  }
  0x2a   : > { %1331 = vmatprep.subr.bf16.mxu0 %v1805_v53  ;;  %v1765_v53 = vld [vmem:[%s2600_s3 + $0xac] ss:$16 sps:$4 sm:$0xff]  }
  0x2b   : > { %782 = vmatpush1.bf16.msra.mxu1 %v1723_v29  ;;  %v343_v29 = vld [vmem:[%s2599_s2] sm:$0x3] }
  0x2c   : > { %783 = vmatprep.subr.bf16.mxu1 %v1724_v30 }
  0x2d   : > { %1332 = vmatpush1.bf16.msra.mxu0 %v1807_v54  ;;  %v1763_v54 = vld [vmem:[%s2600_s3 + $0xa8] ss:$16 sps:$4 sm:$0xff]  }
  0x2e   : > { %1333 = vmatprep.subr.bf16.mxu0 %v1808_v55  ;;  %v1768_v55 = vld [vmem:[%s2600_s3 + $0xcc] ss:$16 sps:$4 sm:$0xff]  }
  0x2f   : > { %784 = vmatpush1.bf16.msra.mxu1 %v1726_v31 }
  0x30   : > { %785 = vmatprep.subr.bf16.mxu1 %v1727_v32 }
  0x31   : > { %1334 = vmatpush1.bf16.msra.mxu0 %v1810_v56  ;;  %v1766_v56 = vld [vmem:[%s2600_s3 + $0xc8] ss:$16 sps:$4 sm:$0xff]  }
  0x32   : > { %1335 = vmatprep.subr.bf16.mxu0 %v1811_v57  ;;  %v1771_v57 = vld [vmem:[%s2600_s3 + $0xec] ss:$16 sps:$4 sm:$0xff]  }
  0x33   : > { %786 = vmatpush1.bf16.msra.mxu1 %v1729_v33 }
  0x34   : > { %787 = vmatprep.subr.bf16.mxu1 %v1730_v34  ;;  %v348_v34 = vrot.slane %v343_v29, %v2238_v20 }
  0x35   : > { %1336 = vmatpush1.bf16.msra.mxu0 %v1813_v58  ;;  %v1769_v58 = vld [vmem:[%s2600_s3 + $0xe8] ss:$16 sps:$4 sm:$0xff]  }
  0x36   : > { %1337 = vmatprep.subr.bf16.mxu0 %v1814_v59  ;;  %v1774_v59 = vld [vmem:[%s2600_s3 + $0x10c] ss:$16 sps:$4 sm:$0xff]  }
  0x37   : > { %788 = vmatpush1.bf16.msra.mxu1 %v1732_v35 }
  0x38   : > { %789 = vmatprep.subr.bf16.mxu1 %v1733_v36 }
  0x39   : > { %1338 = vmatpush1.bf16.msra.mxu0 %v1816_v60  ;;  %v1772_v60 = vld [vmem:[%s2600_s3 + $0x108] ss:$16 sps:$4 sm:$0xff]  }
  0x3a   : > { %1339 = vmatprep.subr.bf16.mxu0 %v1817_v61  ;;  %v1777_v61 = vld [vmem:[%s2600_s3 + $0x12c] ss:$16 sps:$4 sm:$0xff]  }
  0x3b   : > { %790 = vmatpush1.bf16.msra.mxu1 %v1735_v37 }
  0x3c   : > { %791 = vmatprep.subr.bf16.mxu1 %v1736_v38 }
  0x3f   : > { %792 = vmatpush1.bf16.msra.mxu1 %v1738_v39 }
  0x40   : > { %793 = vmatprep.subr.bf16.mxu1 %v1739_v40 }
  0x43   : > { %794 = vmatpush1.bf16.msra.mxu1 %v1741_v41 }
  0x44   : > { %795 = vmatprep.subr.bf16.mxu1 %v1742_v42 }
  0x47   : > { %796 = vmatpush1.bf16.msra.mxu1 %v1744_v43 }
  0x48   : > { %797 = vmatprep.subr.bf16.mxu1 %v1745_v44 }
  0x4b   : > { %798 = vmatpush1.bf16.msra.mxu1 %v1747_v45  ;;  %v1753_v45 = vld [vmem:[%s2600_s3 + $0x2c] ss:$16 sps:$4 sm:$0xff]  }
  0x4c   : > { %810 = vmatprep.subr.bf16.mxu1 %v1750_v46  ;;  %v1751_v46 = vld [vmem:[%s2600_s3 + $0x28] ss:$16 sps:$4 sm:$0xff]  }
  0xaa   : > { %v291_v62 = vpop.xlane.xlu0 %290 }
  0xab   : > { %v305_v63 = vmul.f32 0.00390625, %v291_v62  ;;  %v1775_v62 = vld [vmem:[%s2600_s3 + $0x128] ss:$16 sps:$4 sm:$0xff]  }
  0xac   : > { %v301_v0 = vpop.xlane.xlu1 %300 }
  0xad   : > { %v307_v1 = vmul.f32 0.00390625, %v301_v0  ;;  %v309_v2 = vmul.f32 %v305_v63, %v305_v63  ;;  %v315_v24 = vsub.f32 %v2089_v8, %v305_v63  ;;  %v316_v25 = vsub.f32 %v2091_v9, %v305_v63  ;;  %v1780_v63 = vld [vmem:[%s2600_s3 + $0x14c] ss:$16 sps:$4 sm:$0xff]   ;;  %v1778_v0 = vld [vmem:[%s2600_s3 + $0x148] ss:$16 sps:$4 sm:$0xff]  }
  0xae   : > { %v294_v3 = vpop.xlane.xlu0 %293  ;;  %v352_v8 = vrot.slane %v343_v29, %v2241_v21  ;;  %v1835_v29 = vld [vmem:[%s2602_s5 + $0xd4] ss:$8 sps:$4 sm:$0xff]  }
  0xaf   : > { %v311_v4 = vsub.f32 %v307_v1, %v309_v2  ;;  %v306_v5 = vmul.f32 0.00390625, %v294_v3  ;;  %v1783_v1 = vld [vmem:[%s2600_s3 + $0x16c] ss:$16 sps:$4 sm:$0xff]   ;;  %v1781_v2 = vld [vmem:[%s2600_s3 + $0x168] ss:$16 sps:$4 sm:$0xff]  }
  0xb0   : > { %v304_v6 = vpop.xlane.xlu1 %303  ;;  %v1786_v3 = vld [vmem:[%s2600_s3 + $0x18c] ss:$16 sps:$4 sm:$0xff]  }
  0xb1   : > { %v313_v7 = vmax.f32 %v311_v4, 0.0  ;;  %v308_v12 = vmul.f32 0.00390625, %v304_v6  ;;  %v310_v13 = vmul.f32 %v306_v5, %v306_v5  ;;  %v317_v31 = vsub.f32 %v2093_v10, %v306_v5  ;;  %v1748_v10 = vld [vmem:[%s2600_s3 + $0x8] ss:$16 sps:$4 sm:$0xff]  }
  0xb2   : > { %v318_v32 = vsub.f32 %v2095_v11, %v306_v5  ;;  %v1784_v4 = vld [vmem:[%s2600_s3 + $0x188] ss:$16 sps:$4 sm:$0xff]   ;;  %v1789_v5 = vld [vmem:[%s2600_s3 + $0x1ac] ss:$16 sps:$4 sm:$0xff]  }
  0xb3   : > { %v319_v14 = vadd.f32 1e-05, %v313_v7  ;;  %v312_v15 = vsub.f32 %v308_v12, %v310_v13  ;;  %v1787_v6 = vld [vmem:[%s2600_s3 + $0x1a8] ss:$16 sps:$4 sm:$0xff]   ;;  %v1792_v7 = vld [vmem:[%s2600_s3 + $0x1cc] ss:$16 sps:$4 sm:$0xff]  }
  0xb4   : > { %v1790_v12 = vld [vmem:[%s2600_s3 + $0x1c8] ss:$16 sps:$4 sm:$0xff]   ;;  %v1795_v13 = vld [vmem:[%s2600_s3 + $0x1ec] ss:$16 sps:$4 sm:$0xff]  }
  0xb5   : > { %1892 = vrsqrt.f32 %v319_v14  ;;  %v314_v17 = vmax.f32 %v312_v15, 0.0  ;;  %v1793_v14 = vld [vmem:[%s2600_s3 + $0x1e8] ss:$16 sps:$4 sm:$0xff]  }
  0xb6   : > { %v1819_v15 = vld [vmem:[%s2602_s5 + $0x70] ss:$8 sps:$4 sm:$0xff]  }
  0xb7   : > { %v320_v18 = vadd.f32 1e-05, %v314_v17  ;;  %1340 = vmatpush1.bf16.msra.mxu0 %v1819_v15  ;;  %v1822_v17 = vld [vmem:[%s2602_s5 + $0x80] ss:$8 sps:$4 sm:$0xff]  }
  0xb8   : > { %1341 = vmatprep.subr.bf16.mxu0 %v1820_v16 }
  0xb9   : > { %1894 = vrsqrt.f32 %v320_v18  ;;  %v1823_v18 = vld [vmem:[%s2602_s5 + $0x94] ss:$8 sps:$4 sm:$0xff]  }
  0xbb   : > { %1342 = vmatpush1.bf16.msra.mxu0 %v1822_v17 }
  0xbc   : > { %1343 = vmatprep.subr.bf16.mxu0 %v1823_v18 }
  0xbf   : > { %v1893_v23 = vpop.eup %1892  ;;  %1344 = vmatpush1.bf16.msra.mxu0 %v1825_v22 }
  0xc0   : > { %v324_v26 = vmul.f32 %v1893_v23, %v316_v25  ;;  %v323_v30 = vmul.f32 %v1893_v23, %v315_v24  ;;  %v1826_v23 = vld [vmem:[%s2602_s5 + $0xa4] ss:$8 sps:$4 sm:$0xff]   ;;  %v1828_v24 = vld [vmem:[%s2602_s5 + $0xa0] ss:$8 sps:$4 sm:$0xff]   ;;  %v1829_v25 = vld [vmem:[%s2602_s5 + $0xb4] ss:$8 sps:$4 sm:$0xff]  }
  0xc1   : > { %1345 = vmatprep.subr.bf16.mxu0 %v1826_v23 }
  0xc2   : > { %v340_v35 = vmul.f32 %v336_v28, %v324_v26  ;;  %v339_v37 = vmul.f32 %v332_v27, %v323_v30  ;;  %v1831_v26 = vld [vmem:[%s2602_s5 + $0xb0] ss:$8 sps:$4 sm:$0xff]  }
  0xc3   : > { %v1895_v33 = vpop.eup %1894  ;;  %1346 = vmatpush1.bf16.msra.mxu0 %v1828_v24  ;;  %v1837_v30 = vld [vmem:[%s2602_s5 + $0xd0] ss:$8 sps:$4 sm:$0xff]   ;;  %v1844_v24 = vld [vmem:[%s2602_s5 + $0x100] ss:$8 sps:$4 sm:$0xff]  }
  0xc4   : > { %v326_v9 = vmul.f32 %v1895_v33, %v318_v32  ;;  %v325_v36 = vmul.f32 %v1895_v33, %v317_v31  ;;  %v356_v40 = vadd.f32 %v352_v8, %v340_v35  ;;  %v355_v42 = vadd.f32 %v348_v34, %v339_v37  ;;  %1347 = vmatprep.subr.bf16.mxu0 %v1829_v25  ;;  %v1838_v31 = vld [vmem:[%s2602_s5 + $0xe4] ss:$8 sps:$4 sm:$0xff]   ;;  %v1840_v32 = vld [vmem:[%s2602_s5 + $0xe0] ss:$8 sps:$4 sm:$0xff]   ;;  %v1841_v33 = vld [vmem:[%s2602_s5 + $0xf4] ss:$8 sps:$4 sm:$0xff]  }
  0xc5   : > { %v1849_v25 = vld [vmem:[%s2602_s5 + $0x114] ss:$8 sps:$4 sm:$0xff]  }
  0xc6   : > { %v342_v38 = vmul.f32 %v336_v28, %v326_v9  ;;  %v341_v39 = vmul.f32 %v332_v27, %v325_v36  ;;  %v1832_v27 = vld [vmem:[%s2602_s5 + $0xc4] ss:$8 sps:$4 sm:$0xff]   ;;  %v1834_v28 = vld [vmem:[%s2602_s5 + $0xc0] ss:$8 sps:$4 sm:$0xff]  }
  0xc7   : > { %1348 = vmatpush1.bf16.msra.mxu0 %v1831_v26  ;;  %v2411_v9 = vld [vmem:[%s2601_s4] sm:$0xf]  ;;  %v1847_v26 = vld [vmem:[%s2602_s5 + $0x110] ss:$8 sps:$4 sm:$0xff]  }
  0xc8   : > { %v358_v41 = vadd.f32 %v352_v8, %v342_v38  ;;  %v357_v43 = vadd.f32 %v348_v34, %v341_v39  ;;  %1349 = vmatprep.subr.bf16.mxu0 %v1832_v27  ;;  %v1843_v34 = vld [vmem:[%s2602_s5 + $0xf0] ss:$8 sps:$4 sm:$0xff]   ;;  %v1846_v8 = vld [vmem:[%s2602_s5 + $0x104] ss:$8 sps:$4 sm:$0xff]   ;;  %v430_v35 = vrot.slane %v2411_v9, %v2238_v20  ;;  %v434_v36 = vrot.slane %v2411_v9, %v2241_v21 }
  0xc9   : > { %v1852_v27 = vld [vmem:[%s2602_s5 + $0x124] ss:$8 sps:$4 sm:$0xff]  }
  0xca   : > { %v360_v44 = vpack.c.bf16 %v358_v41, %v356_v40  ;;  %v2260_v11 = vpack.c.bf16 %v357_v43, %v355_v42 }
  0xcb   : > { %1350 = vmatpush1.bf16.msra.mxu0 %v1834_v28  ;;  %v1850_v28 = vld [vmem:[%s2602_s5 + $0x120] ss:$8 sps:$4 sm:$0xff]  }
  0xcc   : > { %799 = vmatprep.mubr.bf16.mxu1 %v360_v44  ;;  %1351 = vmatprep.subr.bf16.mxu0 %v1835_v29  ;;  %v1855_v29 = vld [vmem:[%s2602_s5 + $0x134] ss:$8 sps:$4 sm:$0xff]  }
  0xcd   : > { %800 = vmatmul.mubr.bf16.vlgmr.msra.gmra.mrb[0].mxu1 %v2260_v11 }
  0xce   : > { %811 = vmatpush1.bf16.msra.mxu1 %v1748_v10  ;;  %842 = vmatprep.mubr.bf16.mxu1 %v360_v44 }
  0xcf   : > { %812 = vmatprep.subr.bf16.mxu1 %v1753_v45  ;;  %1352 = vmatpush1.bf16.msra.mxu0 %v1837_v30  ;;  %v1853_v30 = vld [vmem:[%s2602_s5 + $0x130] ss:$8 sps:$4 sm:$0xff]  }
  0xd0   : > { %1353 = vmatprep.subr.bf16.mxu0 %v1838_v31  ;;  %v1858_v31 = vld [vmem:[%s2602_s5 + $0x144] ss:$8 sps:$4 sm:$0xff]  }
  0xd2   : > { %813 = vmatpush1.bf16.msra.mxu1 %v1751_v46 }
  0xd3   : > { %814 = vmatprep.subr.bf16.mxu1 %v1756_v47  ;;  %1354 = vmatpush1.bf16.msra.mxu0 %v1840_v32  ;;  %v1856_v32 = vld [vmem:[%s2602_s5 + $0x140] ss:$8 sps:$4 sm:$0xff]  }
  0xd4   : > { %1355 = vmatprep.subr.bf16.mxu0 %v1841_v33  ;;  %v1861_v33 = vld [vmem:[%s2602_s5 + $0x154] ss:$8 sps:$4 sm:$0xff]  }
  0xd6   : > { %815 = vmatpush1.bf16.msra.mxu1 %v1754_v48 }
  0xd7   : > { %816 = vmatprep.subr.bf16.mxu1 %v1759_v49  ;;  %1356 = vmatpush1.bf16.msra.mxu0 %v1843_v34  ;;  %v1859_v34 = vld [vmem:[%s2602_s5 + $0x150] ss:$8 sps:$4 sm:$0xff]  }
  0xd8   : > { %1368 = vmatprep.subr.bf16.mxu0 %v1846_v8  ;;  %v1864_v8 = vld [vmem:[%s2602_s5 + $0x164] ss:$8 sps:$4 sm:$0xff]  }
  0xda   : > { %817 = vmatpush1.bf16.msra.mxu1 %v1757_v50 }
  0xdb   : > { %818 = vmatprep.subr.bf16.mxu1 %v1762_v51 }
  0xde   : > { %819 = vmatpush1.bf16.msra.mxu1 %v1760_v52 }
  0xdf   : > { %820 = vmatprep.subr.bf16.mxu1 %v1765_v53 }
  0xe2   : > { %821 = vmatpush1.bf16.msra.mxu1 %v1763_v54 }
  0xe3   : > { %822 = vmatprep.subr.bf16.mxu1 %v1768_v55 }
  0xe6   : > { %823 = vmatpush1.bf16.msra.mxu1 %v1766_v56 }
  0xe7   : > { %824 = vmatprep.subr.bf16.mxu1 %v1771_v57 }
  0xea   : > { %825 = vmatpush1.bf16.msra.mxu1 %v1769_v58 }
  0xeb   : > { %826 = vmatprep.subr.bf16.mxu1 %v1774_v59 }
  0xee   : > { %827 = vmatpush1.bf16.msra.mxu1 %v1772_v60 }
  0xef   : > { %828 = vmatprep.subr.bf16.mxu1 %v1777_v61 }
  0xf2   : > { %829 = vmatpush1.bf16.msra.mxu1 %v1775_v62 }
  0xf3   : > { %830 = vmatprep.subr.bf16.mxu1 %v1780_v63 }
  0xf6   : > { %831 = vmatpush1.bf16.msra.mxu1 %v1778_v0 }
  0xf7   : > { %832 = vmatprep.subr.bf16.mxu1 %v1783_v1 }
  0xfa   : > { %833 = vmatpush1.bf16.msra.mxu1 %v1781_v2 }
  0xfb   : > { %834 = vmatprep.subr.bf16.mxu1 %v1786_v3 }
  0xfe   : > { %835 = vmatpush1.bf16.msra.mxu1 %v1784_v4 }
  0xff   : > { %836 = vmatprep.subr.bf16.mxu1 %v1789_v5 }
 0x102   : > { %837 = vmatpush1.bf16.msra.mxu1 %v1787_v6 }
 0x103   : > { %838 = vmatprep.subr.bf16.mxu1 %v1792_v7 }
 0x106   : > { %839 = vmatpush1.bf16.msra.mxu1 %v1790_v12 }
 0x107   : > { %840 = vmatprep.subr.bf16.mxu1 %v1795_v13 }
 0x10a   : > { %841 = vmatpush1.bf16.msra.mxu1 %v1793_v14 }
 0x10d   : > { %843 = vmatmul.mubr.bf16.vlgmr.msra.gmra.mrb[4].mxu1 %v2260_v11 }
 0x1a0   : > { %v801_v37 = vpop.f32.mrb[0].mxu1 }
 0x1a1   : > { %v802_v38 = vadd.f32 %v801_v37, %v430_v35  ;;  %v803_v39 = vpop.f32.mrb[1].mxu1  ;;  %v1867_v37 = vld [vmem:[%s2602_s5 + $0x174] ss:$8 sps:$4 sm:$0xff]  }
 0x1a2   : > { %v804_v40 = vadd.f32 %v803_v39, %v434_v36  ;;  %v805_v41 = vpop.f32.mrb[2].mxu1 }
 0x1a3   : > { %v853_v42 = vmul.f32 %v802_v38, %v802_v38  ;;  %v806_v43 = vadd.f32 %v805_v41, %v430_v35  ;;  %v807_v44 = vpop.f32.mrb[3].mxu1  ;;  %v1862_v35 = vld [vmem:[%s2602_s5 + $0x160] ss:$8 sps:$4 sm:$0xff]  }
 0x1a4   : > { %v854_v10 = vmul.f32 %v804_v40, %v804_v40  ;;  %v808_v11 = vadd.f32 %v807_v44, %v434_v36  ;;  %v437_v36 = vsub.s32 2, %v2235_v19 }
 0x1a5   : > { %v861_v45 = vmul.f32 %v853_v42, %v802_v38  ;;  %v857_v46 = vmul.f32 %v806_v43, %v806_v43  ;;  %v1870_v42 = vld [vmem:[%s2602_s5 + $0x184] ss:$8 sps:$4 sm:$0xff]  }
 0x1a6   : > { %v862_v47 = vmul.f32 %v854_v10, %v804_v40  ;;  %v858_v48 = vmul.f32 %v808_v11, %v808_v11  ;;  %v438_v39 = vrot.slane %v2411_v9, %v437_v36 }
 0x1a7   : > { %v869_v49 = vmul.f32 0.044715, %v861_v45  ;;  %v865_v50 = vmul.f32 %v857_v46, %v806_v43 }
 0x1a8   : > { %v870_v51 = vmul.f32 0.044715, %v862_v47  ;;  %v866_v52 = vmul.f32 %v858_v48, %v808_v11 }
 0x1a9   : > { %v877_v53 = vadd.f32 %v869_v49, %v802_v38  ;;  %v873_v54 = vmul.f32 0.044715, %v865_v50 }
 0x1aa   : > { %v874_v55 = vmul.f32 0.044715, %v866_v52  ;;  %v878_v56 = vadd.f32 %v870_v51, %v804_v40 }
 0x1ab   : > { %v885_v57 = vmul.f32 0.7978846, %v877_v53  ;;  %v881_v58 = vadd.f32 %v873_v54, %v806_v43  ;;  %v1871_v53 = vld [vmem:[%s2602_s5 + $0x190] ss:$8 sps:$4 sm:$0xff]  }
 0x1ac   : > { %v882_v59 = vadd.f32 %v874_v55, %v808_v11  ;;  %v886_v60 = vmul.f32 0.7978846, %v878_v56  ;;  %v1876_v56 = vld [vmem:[%s2602_s5 + $0x1a4] ss:$8 sps:$4 sm:$0xff]  }
 0x1ad   : > { %1896 = vtanh.f32 %v885_v57  ;;  %v889_v61 = vmul.f32 0.7978846, %v881_v58 }
 0x1ae   : > { %v890_v62 = vmul.f32 0.7978846, %v882_v59  ;;  %1898 = vtanh.f32 %v886_v60 }
 0x1af   : > { %1900 = vtanh.f32 %v889_v61 }
 0x1b0   : > { %1902 = vtanh.f32 %v890_v62 }
 0x1b7   : > { %v1897_v63 = vpop.eup %1896 }
 0x1b8   : > { %v1899_v0 = vpop.eup %1898  ;;  %v901_v1 = vadd.f32 1.0, %v1897_v63  ;;  %v1874_v63 = vld [vmem:[%s2602_s5 + $0x1a0] ss:$8 sps:$4 sm:$0xff]  }
 0x1b9   : > { %v1901_v2 = vpop.eup %1900  ;;  %v902_v3 = vadd.f32 1.0, %v1899_v0 }
 0x1ba   : > { %v1903_v4 = vpop.eup %1902  ;;  %v905_v5 = vadd.f32 1.0, %v1901_v2  ;;  %v909_v6 = vmul.f32 0.5, %v901_v1  ;;  %v1879_v2 = vld [vmem:[%s2602_s5 + $0x1b4] ss:$8 sps:$4 sm:$0xff]  }
 0x1bb   : > { %v906_v7 = vadd.f32 1.0, %v1903_v4  ;;  %v910_v12 = vmul.f32 0.5, %v902_v3 }
 0x1bc   : > { %v913_v13 = vmul.f32 0.5, %v905_v5  ;;  %v917_v15 = vmul.f32 %v909_v6, %v802_v38  ;;  %v441_v38 = vsub.s32 3, %v2235_v19  ;;  %v1868_v19 = vld [vmem:[%s2602_s5 + $0x180] ss:$8 sps:$4 sm:$0xff]  }
 0x1bd   : > { %v914_v14 = vmul.f32 0.5, %v906_v7  ;;  %v918_v17 = vmul.f32 %v910_v12, %v804_v40  ;;  %v1865_v40 = vld [vmem:[%s2602_s5 + $0x170] ss:$8 sps:$4 sm:$0xff]  }
 0x1be   : > { %v921_v16 = vmul.f32 %v913_v13, %v806_v43  ;;  %v442_v41 = vrot.slane %v2411_v9, %v441_v38  ;;  %v1873_v9 = vld [vmem:[%s2602_s5 + $0x194] ss:$8 sps:$4 sm:$0xff]   ;;  %v1877_v12 = vld [vmem:[%s2602_s5 + $0x1b0] ss:$8 sps:$4 sm:$0xff]  }
 0x1bf   : > { %v922_v18 = vmul.f32 %v914_v14, %v808_v11  ;;  %v1882_v14 = vld [vmem:[%s2602_s5 + $0x1c4] ss:$8 sps:$4 sm:$0xff]  }
 0x1c0   : > { %v925_v22 = vpack.c.bf16 %v921_v16, %v917_v15  ;;  %v1880_v15 = vld [vmem:[%s2602_s5 + $0x1c0] ss:$8 sps:$4 sm:$0xff]   ;;  %v1885_v16 = vld [vmem:[%s2602_s5 + $0x1d4] ss:$8 sps:$4 sm:$0xff]  }
 0x1c1   : > { %v926_v23 = vpack.c.bf16 %v922_v18, %v918_v17  ;;  %v1883_v17 = vld [vmem:[%s2602_s5 + $0x1d0] ss:$8 sps:$4 sm:$0xff]   ;;  %v1888_v18 = vld [vmem:[%s2602_s5 + $0x1e4] ss:$8 sps:$4 sm:$0xff]  }
 0x1c3   : > { %1357 = vmatprep.mubr.bf16.mxu0 %v926_v23 }
 0x1c4   : > { %1358 = vmatmul.mubr.bf16.vlgmr.msra.gmra.mrb[0].mxu0 %v925_v22 }
 0x1c5   : > { %1369 = vmatpush1.bf16.msra.mxu0 %v1844_v24 }
 0x1c6   : > { %1370 = vmatprep.subr.bf16.mxu0 %v1849_v25 }
 0x1c9   : > { %1371 = vmatpush1.bf16.msra.mxu0 %v1847_v26  ;;  %v1886_v26 = vld [vmem:[%s2602_s5 + $0x1e0] ss:$8 sps:$4 sm:$0xff]  }
 0x1ca   : > { %1372 = vmatprep.subr.bf16.mxu0 %v1852_v27 }
 0x1cd   : > { %1373 = vmatpush1.bf16.msra.mxu0 %v1850_v28 }
 0x1ce   : > { %1374 = vmatprep.subr.bf16.mxu0 %v1855_v29 }
 0x1d1   : > { %1375 = vmatpush1.bf16.msra.mxu0 %v1853_v30 }
 0x1d2   : > { %1376 = vmatprep.subr.bf16.mxu0 %v1858_v31  ;;  %v1891_v31 = vld [vmem:[%s2602_s5 + $0x1f4] ss:$8 sps:$4 sm:$0xff]  }
 0x1d5   : > { %1377 = vmatpush1.bf16.msra.mxu0 %v1856_v32 }
 0x1d6   : > { %1378 = vmatprep.subr.bf16.mxu0 %v1861_v33 }
 0x1d9   : > { %1379 = vmatpush1.bf16.msra.mxu0 %v1859_v34 }
 0x1da   : > { %1380 = vmatprep.subr.bf16.mxu0 %v1864_v8  ;;  %v1889_v8 = vld [vmem:[%s2602_s5 + $0x1f0] ss:$8 sps:$4 sm:$0xff]  }
 0x1dd   : > { %1381 = vmatpush1.bf16.msra.mxu0 %v1862_v35 }
 0x1de   : > { %1382 = vmatprep.subr.bf16.mxu0 %v1867_v37 }
 0x1e0   : > { %v844_v43 = vpop.f32.mrb[4].mxu1 }
 0x1e1   : > { %v2469_v44 = vadd.f32 %v844_v43, %v438_v39  ;;  %v846_v10 = vpop.f32.mrb[5].mxu1  ;;  %1383 = vmatpush1.bf16.msra.mxu0 %v1865_v40 }
 0x1e2   : > { %v2474_v11 = vadd.f32 %v846_v10, %v442_v41  ;;  %v848_v45 = vpop.f32.mrb[6].mxu1  ;;  %1384 = vmatprep.subr.bf16.mxu0 %v1870_v42  ;;  %v993_v42 = vld [vmem:[%s2603_s6] sm:$0x3] }
 0x1e3   : > { %v855_v46 = vmul.f32 %v2469_v44, %v2469_v44  ;;  %v2481_v47 = vadd.f32 %v848_v45, %v438_v39  ;;  %v850_v48 = vpop.f32.mrb[7].mxu1  ;;  %v998_v43 = vrot.slane %v993_v42, %v2238_v20 }
 0x1e4   : > { %v856_v49 = vmul.f32 %v2474_v11, %v2474_v11  ;;  %v2485_v50 = vadd.f32 %v850_v48, %v442_v41 }
 0x1e5   : > { %v863_v51 = vmul.f32 %v855_v46, %v2469_v44  ;;  %v859_v52 = vmul.f32 %v2481_v47, %v2481_v47  ;;  %1385 = vmatpush1.bf16.msra.mxu0 %v1868_v19 }
 0x1e6   : > { %v864_v54 = vmul.f32 %v856_v49, %v2474_v11  ;;  %v860_v55 = vmul.f32 %v2485_v50, %v2485_v50  ;;  %1386 = vmatprep.subr.bf16.mxu0 %v1873_v9 }
 0x1e7   : > { %v871_v57 = vmul.f32 0.044715, %v863_v51  ;;  %v867_v58 = vmul.f32 %v859_v52, %v2481_v47 }
 0x1e8   : > { %v872_v59 = vmul.f32 0.044715, %v864_v54  ;;  %v868_v60 = vmul.f32 %v860_v55, %v2485_v50 }
 0x1e9   : > { %v879_v61 = vadd.f32 %v871_v57, %v2469_v44  ;;  %v875_v62 = vmul.f32 0.044715, %v867_v58  ;;  %1387 = vmatpush1.bf16.msra.mxu0 %v1871_v53 }
 0x1ea   : > { %v880_v0 = vadd.f32 %v872_v59, %v2474_v11  ;;  %v876_v1 = vmul.f32 0.044715, %v868_v60  ;;  %1388 = vmatprep.subr.bf16.mxu0 %v1876_v56 }
 0x1eb   : > { %v887_v3 = vmul.f32 0.7978846, %v879_v61  ;;  %v883_v4 = vadd.f32 %v875_v62, %v2481_v47 }
 0x1ec   : > { %v888_v5 = vmul.f32 0.7978846, %v880_v0  ;;  %v884_v6 = vadd.f32 %v876_v1, %v2485_v50 }
 0x1ed   : > { %1904 = vtanh.f32 %v887_v3  ;;  %v891_v7 = vmul.f32 0.7978846, %v883_v4  ;;  %1389 = vmatpush1.bf16.msra.mxu0 %v1874_v63 }
 0x1ee   : > { %1906 = vtanh.f32 %v888_v5  ;;  %v892_v13 = vmul.f32 0.7978846, %v884_v6  ;;  %1390 = vmatprep.subr.bf16.mxu0 %v1879_v2 }
 0x1ef   : > { %1908 = vtanh.f32 %v891_v7 }
 0x1f0   : > { %1910 = vtanh.f32 %v892_v13 }
 0x1f1   : > { %1391 = vmatpush1.bf16.msra.mxu0 %v1877_v12 }
 0x1f2   : > { %1392 = vmatprep.subr.bf16.mxu0 %v1882_v14 }
 0x1f5   : > { %1393 = vmatpush1.bf16.msra.mxu0 %v1880_v15 }
 0x1f6   : > { %1394 = vmatprep.subr.bf16.mxu0 %v1885_v16 }
 0x1f7   : > { %v1905_v22 = vpop.eup %1904 }
 0x1f8   : > { %v1907_v23 = vpop.eup %1906  ;;  %v903_v24 = vadd.f32 1.0, %v1905_v22 }
 0x1f9   : > { %v1909_v25 = vpop.eup %1908  ;;  %1395 = vmatpush1.bf16.msra.mxu0 %v1883_v17  ;;  %v904_v27 = vadd.f32 1.0, %v1907_v23 }
 0x1fa   : > { %v1911_v28 = vpop.eup %1910  ;;  %v911_v29 = vmul.f32 0.5, %v903_v24  ;;  %v907_v30 = vadd.f32 1.0, %v1909_v25  ;;  %1396 = vmatprep.subr.bf16.mxu0 %v1888_v18 }
 0x1fb   : > { %v908_v32 = vadd.f32 1.0, %v1911_v28  ;;  %v912_v33 = vmul.f32 0.5, %v904_v27 }
 0x1fc   : > { %v915_v34 = vmul.f32 0.5, %v907_v30  ;;  %v919_v36 = vmul.f32 %v911_v29, %v2469_v44  ;;  %v1002_v44 = vrot.slane %v993_v42, %v2241_v21 }
 0x1fd   : > { %1397 = vmatpush1.bf16.msra.mxu0 %v1886_v26  ;;  %v916_v35 = vmul.f32 0.5, %v908_v32  ;;  %v920_v38 = vmul.f32 %v912_v33, %v2474_v11 }
 0x1fe   : > { %v923_v37 = vmul.f32 %v915_v34, %v2481_v47  ;;  %1398 = vmatprep.subr.bf16.mxu0 %v1891_v31 }
 0x1ff   : > { %v924_v39 = vmul.f32 %v916_v35, %v2485_v50 }
 0x200   : > { %v927_v40 = vpack.c.bf16 %v923_v37, %v919_v36 }
 0x201   : > { %1399 = vmatpush1.bf16.msra.mxu0 %v1889_v8  ;;  %v928_v41 = vpack.c.bf16 %v924_v39, %v920_v38 }
 0x203   : > { %1400 = vmatprep.mubr.bf16.mxu0 %v928_v41 }
 0x204   : > { %1401 = vmatmul.mubr.bf16.vlgmr.msra.gmra.mrb[0].mxu0 %v927_v40 }
 0x2d7   : > { %v1402_v10 = vpop.f32.mrb[0].mxu0 }
 0x2d8   : > { %v1651_v19 = vadd.f32 %v1402_v10, %v998_v43  ;;  %v1404_v11 = vpop.f32.mrb[1].mxu0 }
 0x2d9   : > { %v1652_v45 = vadd.f32 %v1404_v11, %v1002_v44  ;;  %v1406_v9 = vpop.f32.mrb[2].mxu0 }
 0x2da   : > { %v1653_v46 = vadd.f32 %v1406_v9, %v998_v43  ;;  %v1408_v47 = vpop.f32.mrb[3].mxu0 }
 0x2db   : > { %v1647_v48 = vpack.c.bf16 %v1652_v45, %v1651_v19  ;;  %v1654_v49 = vadd.f32 %v1408_v47, %v1002_v44 }
 0x2dd   : > { %1423 = vst [vmem:[%s274_s18] sm:$0xff] %v1647_v48  ;;  %v1648_v20 = vpack.c.bf16 %v1654_v49, %v1653_v46 }
 0x2df   : > { %1424 = vst [vmem:[%s274_s18 + $0x8] sm:$0xff] %v1648_v20 }
 0x2e0   : > { %1925 = shalt.err (!%p1922_p3)
}
 0x2e1   : > { %s1926_s15 = scalar_lea.hbm %s2554_s23, 256  ;;  %s1930_s17 = scalar_lea.hbm %s2604_s7, 512 }
 0x2e2   : > { %p1927_p4 = scmp.ne.s32.totalorder %s2554_s23, %s1926_s15  ;;  %p1931_p9 = scmp.lt.u32.totalorder %s2554_s23, %s2604_s7 }
 0x2e3   : > { %p1932_p10 = scmp.lt.u32.totalorder %s1930_s17, %s1926_s15  ;;  %p1934_p12 = scmp.lt.u32.totalorder %s1926_s15, %s2554_s23 }
 0x2e4   : > { %p1928_p7 = pnand %p1927_p4, %p2057_p5 }
 0x2e5   : > { %p1933_p11 = por %p1932_p10, %p1931_p9 }
 0x2e6   : > { %p1929_p8 = pneg %p1928_p7 }
 0x2e7   : > { %p1935_p13 = por %p1934_p12, %p1933_p11 }
 0x2e9   : > { %p1936_p0 = pnand %p1935_p13, %p1929_p8 }
 0x2eb   : > { %1939 = shalt.err (!%p1936_p0)
}
 0x2ec   : > { %s1977_s21 = smov 128   ;;  %s1978_s22 = smov 8  }
 0x2ed   : > { %1659 = dma.vmem_to_hbm [thread:$0]  (%p2057_p5), %s2549_s19, 256, %s2554_s23, %s2556_s29, %s1977_s21, %s1977_s21, %s1978_s22  }
 0x2ee PF: > { %p1665_p1 = scmp.ge.s32.totalorder %s1974_s27, 2  ;;  %s1455_s28 = sand.u32 1, %s1962_s24  }
 0x2ef   : > { %s1456_s8 = scalar_lea.sflag [#allocation3], %s1455_s28 }
 0x2f0   : > { %p1662_p2 = pnand %p1665_p1, %p2061_p6 }
 0x2f2   : > { %1957 = dma.done.wait (!%p1662_p2), %s1456_s8, 256  }
 0x2f3   : > { %1959 = vsyncadd (!%p1662_p2), %s1456_s8, 4294967040  ;;  %p17_p3 = scmp.ge.s32.totalorder %s2044_s30, 4   ;;  %s2607_s24 = smov %s1966_s25 }
 0x2f4   : > { %s2608_s25 = smov %s1970_s26  ;;  %s2609_s26 = smov %s2055_s10 }
 0x2f5   : > { %s2610_s27 = smov %s2044_s30  ;;  %19 = sbr.rel (!%p17_p3) target bundleno = 3 (0x3), region = 83 }
 0x2fc   :  { %1461 = vsyncpa [#allocation3], 1 }
 0x2fd   :  { %1463 = vsyncpa [#allocation3 + $0x1], 1 }

</bundles_post_ra>
